<compile_context>
chip_gen: v6e
topology: v6e:2x2x1
jax: 0.10.0
libtpu: 0.0.40
codegen_flags: <defaults>
</compile_context>

<pallas_src>
import functools

import jax
import jax.numpy as jnp
import numpy as np
from jax.experimental import pallas as pl
from jax.experimental.pallas import tpu as pltpu


def _pool_kernel(seq_ref, mask_col_ref, mask_row_ref,
                 mean_ref, max_ref, cls_ref, cnt_sc, *,
                 seq_len, block_t, use_mxu):
    """Masked mean / masked max / cls pooling, accumulated over the T grid axis.

    seq_ref      : (TB, TT, D) native-dtype token embeddings (bf16 / f32)
    mask_col_ref : (TB, TT, 1) int32 padding mask (1 = real token, 0 = padding)
    mask_row_ref : (TB, 1, TT) native-dtype 0/1 mask (MXU row operand)
    mean_ref     : (TB, 1, D)  f32 masked mean over tokens  (np.ma .mean(axis=1))
    max_ref      : (TB, 1, D)  f32 masked max  over tokens  (np.ma .max(axis=1))
    cls_ref      : (TB, 1, D)  f32 sequence_output[:, 0, :] (cls_token strategy)
    cnt_sc       : (TB, 1, 1)  f32 running token count (VMEM scratch)
    """
    t = pl.program_id(1)

    x = seq_ref[...]                     # (TB, TT, D) native dtype
    keep = mask_col_ref[...] != 0        # (TB, TT, 1) bool

    has_tail = (seq_len % block_t) != 0  # static Python bool
    if has_tail:
        # Grid-tail masking: tokens past the real T live in an undefined
        # padded region of the last block and must be excluded explicitly.
        tok = jax.lax.broadcasted_iota(jnp.int32, keep.shape, 1) + t * block_t
        in_range = tok < seq_len                          # (TB, TT, 1)
        keep = jnp.logical_and(keep, in_range)

    @pl.when(t == 0)
    def _init():
        mean_ref[...] = jnp.zeros_like(mean_ref)
        max_ref[...] = jnp.full(max_ref.shape, -jnp.inf, dtype=max_ref.dtype)
        cnt_sc[...] = jnp.zeros_like(cnt_sc)
        # cls_token: the global first token always lives in the t == 0 tile.
        cls_ref[...] = x[:, 0:1, :].astype(cls_ref.dtype)

    # ---- masked sum -------------------------------------------------------
    if not use_mxu:
        # f32 inputs: HBM-bound anyway; exact f32 select + sum on the VPU.
        x_sel = jnp.where(keep, x, jnp.zeros((), x.dtype))
        mean_ref[...] += jnp.sum(x_sel, axis=1, keepdims=True)     # (TB,1,D)
    else:
        # bf16 inputs: contract the token axis on the (otherwise idle) MXU,
        # f32 accumulation -- takes cast/select/add off the VPU hot path.
        keep_row = mask_row_ref[...]                               # (TB,1,TT)
        x_mm = x
        if has_tail:
            # Undefined tail data may hold NaN/Inf; 0-multiplication would not
            # suppress it in the contraction, so zero both operands there.
            row_tok = (jax.lax.broadcasted_iota(jnp.int32, keep_row.shape, 2)
                       + t * block_t)
            keep_row = jnp.where(row_tok < seq_len, keep_row,
                                 jnp.zeros((), keep_row.dtype))
            x_mm = jnp.where(in_range, x, jnp.zeros((), x.dtype))
        mean_ref[...] += jax.lax.dot_general(
            keep_row, x_mm,
            dimension_numbers=(((2,), (1,)), ((0,), (0,))),
            preferred_element_type=jnp.float32)                    # (TB,1,D)

    # ---- token count ------------------------------------------------------
    cnt_sc[...] += jnp.sum(keep.astype(jnp.float32), axis=1, keepdims=True)

    # ---- masked max (native dtype select + max; exact for bf16) -----------
    neg = jnp.asarray(-jnp.inf, dtype=x.dtype)
    tile_max = jnp.max(jnp.where(keep, x, neg), axis=1, keepdims=True)
    max_ref[...] = jnp.maximum(max_ref[...], tile_max.astype(jnp.float32))

    @pl.when(t == pl.num_programs(1) - 1)
    def _finalize():
        # Guard count==0 (fully padded / cls-only rows): mean -> 0, not nan.
        cnt = jnp.maximum(cnt_sc[...], 1.0)
        mean_ref[...] = mean_ref[...] / cnt       # exact divide, off hot path


def _largest_divisor_leq(n, cap):
    cap = max(1, min(cap, n))
    for d in range(cap, 0, -1):
        if n % d == 0:
            return d
    return 1


def _choose_tiles(B, T, D, itemsize):
    """Pick (TB, TT) tiles: lane/sublane-legal, <= ~8 MiB per input buffer,
    and >= 2 blocks on the parallel batch axis whenever B allows it."""
    tb = _largest_divisor_leq(B, 8)
    if B >= 2 and B // tb < 2:
        tb = _largest_divisor_leq(B, B // 2)   # keep both v7x TCs busy

    budget = 8 * 1024 * 1024   # per-buffer cap; x2 double buffers fits all gens
    if T % 128 == 0:
        tt = 128
        while (tt * 2 <= T and T % (tt * 2) == 0
               and tb * (tt * 2) * D * itemsize <= budget):
            tt *= 2
    else:
        if tb * T * D * itemsize <= budget:
            tt = T                             # single seq block, no tail
        else:
            tt = 512                           # 128-aligned tile + in-kernel tail mask
            while tt > 128 and tb * tt * D * itemsize > budget:
                tt //= 2
            if tt >= T:
                tt = T
    return tb, tt


def masked_pool(sequence_output, padding_mask, ignore_first_token=True,
                *, block_b=None, block_t=None):
    """JAX wrapper reproducing ILanguageModel._pool_tokens semantics.

    Returns (reduce_mean, reduce_max, cls_token) pooled vectors, each (B, D) f32.
    sequence_output is streamed in its native dtype (bf16/f32); padding_mask is
    the usual int attention mask (1 = real token, 0 = padding).
    """
    B, T, D = sequence_output.shape
    dtype = sequence_output.dtype
    itemsize = jnp.dtype(dtype).itemsize
    use_mxu = itemsize < 4     # bf16/fp16 -> MXU contraction; f32 -> exact VPU path

    mask_i32 = padding_mask.astype(jnp.int32)
    if ignore_first_token:
        mask_i32 = mask_i32.at[:, 0].set(0)    # fold into the mask, off the hot loop

    mask_col = mask_i32[:, :, None]                         # (B, T, 1) int32
    mask_row = (mask_i32 != 0).astype(dtype)[:, None, :]    # (B, 1, T) native 0/1

    tb, tt = _choose_tiles(B, T, D, itemsize)
    if block_b is not None:
        tb = block_b
    if block_t is not None:
        tt = block_t
    assert B % tb == 0, "batch tile must divide B"
    assert tt == T or tt % 128 == 0, "sequence tile must be 128-aligned or == T"
    grid = (B // tb, pl.cdiv(T, tt))

    kernel = functools.partial(_pool_kernel, seq_len=T, block_t=tt, use_mxu=use_mxu)

    # Outputs are (B, 1, D): D lane-dense, batch on the unconstrained 3rd dim;
    # squeezed to (B, D) wrapper-side (free reshape).
    out_shapes = tuple(jax.ShapeDtypeStruct((B, 1, D), jnp.float32) for _ in range(3))

    grid_spec = pltpu.PrefetchScalarGridSpec(
        num_scalar_prefetch=0,
        grid=grid,
        in_specs=[
            pl.BlockSpec((tb, tt, D), lambda b, t: (b, t, 0)),   # activations
            pl.BlockSpec((tb, tt, 1), lambda b, t: (b, t, 0)),   # mask, T on sublanes
            pl.BlockSpec((tb, 1, tt), lambda b, t: (b, 0, t)),   # mask, MXU row operand
        ],
        out_specs=[
            pl.BlockSpec((tb, 1, D), lambda b, t: (b, 0, 0)),    # reduce_mean (accum)
            pl.BlockSpec((tb, 1, D), lambda b, t: (b, 0, 0)),    # reduce_max  (accum)
            pl.BlockSpec((tb, 1, D), lambda b, t: (b, 0, 0)),    # cls_token
        ],
        scratch_shapes=[
            pltpu.VMEM((tb, 1, 1), jnp.float32),                 # running token count
        ],
    )

    mean_v, max_v, cls_v = pl.pallas_call(
        kernel,
        out_shape=out_shapes,
        grid_spec=grid_spec,
        compiler_params=pltpu.CompilerParams(
            dimension_semantics=("parallel", "arbitrary"),
            vmem_limit_bytes=32 * 1024 * 1024),
    )(sequence_output, mask_col, mask_row)

    return mean_v.reshape(B, D), max_v.reshape(B, D), cls_v.reshape(B, D)


# TODO(synk): ILanguageModel.forward is abstract (no concrete encoder here);
# only the pooling compute path (_pool_tokens / cls extraction) is kernelized.
# The 'pooled' strategy needs a concrete encoder's pooled_output and is not
# reproducible from this abstract class.


def _reference_pool(seq_f32, mask, ignore_first_token=True):
    """Pure-numpy reference mirroring _pool_tokens (np.ma semantics)."""
    seq = np.asarray(seq_f32, dtype=np.float32)
    mask = np.asarray(mask)
    ignore_2d = (mask == 0).copy()
    if ignore_first_token:
        ignore_2d[:, 0] = True
    ignore_3d = np.zeros(seq.shape, dtype=bool)
    ignore_3d[:, :, :] = ignore_2d[:, :, np.newaxis]
    mean = np.ma.array(data=seq, mask=ignore_3d).mean(axis=1).data
    mx = np.ma.array(data=seq, mask=ignore_3d).max(axis=1).data
    cls = seq[:, 0, :]
    return (np.asarray(mean, np.float32), np.asarray(mx, np.float32),
            np.asarray(cls, np.float32))


if __name__ == "__main__":
    key = jax.random.PRNGKey(0)
    k1, k2, k3 = jax.random.split(key, 3)

    # ---- Test 1: small f32 problem (exact VPU path, single seq block) -------
    B, T, D = 2, 8, 32
    sequence_output = jax.random.normal(k1, (B, T, D), dtype=jnp.float32)
    padding_mask = jnp.array(
        [[1, 1, 1, 1, 1, 1, 1, 1],
         [1, 1, 1, 1, 1, 0, 0, 0]], dtype=jnp.int32)

    mean_v, max_v, cls_v = masked_pool(sequence_output, padding_mask,
                                       ignore_first_token=True)
    jax.block_until_ready((mean_v, max_v, cls_v))

    r_mean, r_max, r_cls = _reference_pool(np.asarray(sequence_output),
                                           np.asarray(padding_mask))
    np.testing.assert_allclose(np.asarray(mean_v), r_mean, rtol=1e-5, atol=1e-5)
    np.testing.assert_allclose(np.asarray(max_v), r_max, rtol=1e-6, atol=1e-6)
    np.testing.assert_allclose(np.asarray(cls_v), r_cls, rtol=1e-6, atol=1e-6)

    # ---- Test 2: bf16 streaming, MXU sum, tiled grid (2 batch x 2 seq blocks)
    B2, T2, D2 = 16, 256, 128
    seq2 = jax.random.normal(k2, (B2, T2, D2), dtype=jnp.float32).astype(jnp.bfloat16)
    lengths = np.linspace(2, T2, B2).astype(np.int32)          # >= 2 valid tokens/row
    mask2 = jnp.asarray((np.arange(T2)[None, :] < lengths[:, None]).astype(np.int32))

    mean2, max2, cls2 = masked_pool(seq2, mask2, ignore_first_token=True,
                                    block_b=8, block_t=128)
    jax.block_until_ready((mean2, max2, cls2))

    seq2_f32 = np.asarray(seq2.astype(jnp.float32))
    r_mean2, r_max2, r_cls2 = _reference_pool(seq2_f32, np.asarray(mask2))
    np.testing.assert_allclose(np.asarray(mean2), r_mean2, rtol=1e-4, atol=1e-4)
    np.testing.assert_allclose(np.asarray(max2), r_max2, rtol=1e-6, atol=1e-6)
    np.testing.assert_allclose(np.asarray(cls2), r_cls2, rtol=1e-6, atol=1e-6)

    # ---- Test 3: bf16 with unaligned T (cdiv grid + in-kernel tail masking) --
    B3, T3, D3 = 4, 200, 128
    seq3 = jax.random.normal(k3, (B3, T3, D3), dtype=jnp.float32).astype(jnp.bfloat16)
    lengths3 = np.array([2, 67, 133, 200], dtype=np.int32)
    mask3 = jnp.asarray((np.arange(T3)[None, :] < lengths3[:, None]).astype(np.int32))

    mean3, max3, cls3 = masked_pool(seq3, mask3, ignore_first_token=True,
                                    block_t=128)
    jax.block_until_ready((mean3, max3, cls3))

    seq3_f32 = np.asarray(seq3.astype(jnp.float32))
    r_mean3, r_max3, r_cls3 = _reference_pool(seq3_f32, np.asarray(mask3))
    np.testing.assert_allclose(np.asarray(mean3), r_mean3, rtol=1e-4, atol=1e-4)
    np.testing.assert_allclose(np.asarray(max3), r_max3, rtol=1e-6, atol=1e-6)
    np.testing.assert_allclose(np.asarray(cls3), r_cls3, rtol=1e-6, atol=1e-6)

    print("KERNEL_OK")
</pallas_src>

<mosaic_0001>
module attributes {stable_mosaic.version = 11 : i64} {
  func.func @_pool_kernel(%arg0: i32, %arg1: i32, %arg2: memref<1x8x32xf32, #tpu.memory_space<vmem>>, %arg3: memref<1x8x1xi32, #tpu.memory_space<vmem>>, %arg4: memref<1x1x8xf32, #tpu.memory_space<vmem>>, %arg5: memref<1x1x32xf32, #tpu.memory_space<vmem>>, %arg6: memref<1x1x32xf32, #tpu.memory_space<vmem>>, %arg7: memref<1x1x32xf32, #tpu.memory_space<vmem>>, %arg8: memref<1x1x1xf32, #tpu.memory_space<vmem>>) attributes {dimension_semantics = [#tpu.dimension_semantics<parallel>, #tpu.dimension_semantics<arbitrary>], iteration_bounds = array<i64: 2, 1>, scalar_prefetch = 0 : i64, scratch_operands = 1 : i64, tpu.core_type = #tpu.core_type<tc>, window_params = [{transform_indices = @transform_0, window_bounds = array<i64: 1, 8, 32>}, {transform_indices = @transform_1, window_bounds = array<i64: 1, 8, 1>}, {transform_indices = @transform_2, window_bounds = array<i64: 1, 1, 8>}, {transform_indices = @transform_3, window_bounds = array<i64: 1, 1, 32>}, {transform_indices = @transform_4, window_bounds = array<i64: 1, 1, 32>}, {transform_indices = @transform_5, window_bounds = array<i64: 1, 1, 32>}]} {
    %c0 = arith.constant 0 : index
    %c0_0 = arith.constant 0 : index
    %c0_1 = arith.constant 0 : index
    %0 = vector.load %arg2[%c0, %c0_0, %c0_1] : memref<1x8x32xf32, #tpu.memory_space<vmem>>, vector<1x8x32xf32>
    %c0_2 = arith.constant 0 : index
    %c0_3 = arith.constant 0 : index
    %c0_4 = arith.constant 0 : index
    %1 = vector.load %arg3[%c0_2, %c0_3, %c0_4] : memref<1x8x1xi32, #tpu.memory_space<vmem>>, vector<1x8x1xi32>
    %c0_i32 = arith.constant 0 : i32
    %2 = vector.broadcast %c0_i32 : i32 to vector<1x8x1xi32>
    %3 = arith.cmpi ne, %1, %2 : vector<1x8x1xi32>
    %c0_i32_5 = arith.constant 0 : i32
    %4 = arith.cmpi eq, %arg1, %c0_i32_5 : i32
    %5 = arith.extui %4 : i1 to i32
    %c0_i32_6 = arith.constant 0 : i32
    %6 = arith.cmpi ne, %5, %c0_i32_6 : i32
    scf.if %6 {
      %cst_31 = arith.constant 0.000000e+00 : f32
      %35 = vector.broadcast %cst_31 : f32 to vector<1x1x32xf32>
      %c0_32 = arith.constant 0 : index
      %c0_33 = arith.constant 0 : index
      %c0_34 = arith.constant 0 : index
      %36 = vector.load %arg5[%c0_32, %c0_33, %c0_34] : memref<1x1x32xf32, #tpu.memory_space<vmem>>, vector<1x1x32xf32>
      tpu.vector_store %arg5[%c0_32, %c0_33, %c0_34], %35 {strides = array<i32>} : memref<1x1x32xf32, #tpu.memory_space<vmem>>, vector<1x1x32xf32>,
      %cst_35 = arith.constant 0xFF800000 : f32
      %37 = vector.broadcast %cst_35 : f32 to vector<1x1x32xf32>
      %c0_36 = arith.constant 0 : index
      %c0_37 = arith.constant 0 : index
      %c0_38 = arith.constant 0 : index
      %38 = vector.load %arg6[%c0_36, %c0_37, %c0_38] : memref<1x1x32xf32, #tpu.memory_space<vmem>>, vector<1x1x32xf32>
      tpu.vector_store %arg6[%c0_36, %c0_37, %c0_38], %37 {strides = array<i32>} : memref<1x1x32xf32, #tpu.memory_space<vmem>>, vector<1x1x32xf32>,
      %cst_39 = arith.constant 0.000000e+00 : f32
      %39 = vector.broadcast %cst_39 : f32 to vector<1x1x1xf32>
      %c0_40 = arith.constant 0 : index
      %c0_41 = arith.constant 0 : index
      %c0_42 = arith.constant 0 : index
      %40 = vector.load %arg8[%c0_40, %c0_41, %c0_42] : memref<1x1x1xf32, #tpu.memory_space<vmem>>, vector<1x1x1xf32>
      tpu.vector_store %arg8[%c0_40, %c0_41, %c0_42], %39 {strides = array<i32>} : memref<1x1x1xf32, #tpu.memory_space<vmem>>, vector<1x1x1xf32>,
      %41 = vector.extract_strided_slice %0 {offsets = [0, 0, 0], sizes = [1, 1, 32], strides = [1, 1, 1]} : vector<1x8x32xf32> to vector<1x1x32xf32>
      %c0_43 = arith.constant 0 : index
      %c0_44 = arith.constant 0 : index
      %c0_45 = arith.constant 0 : index
      %42 = vector.load %arg7[%c0_43, %c0_44, %c0_45] : memref<1x1x32xf32, #tpu.memory_space<vmem>>, vector<1x1x32xf32>
      tpu.vector_store %arg7[%c0_43, %c0_44, %c0_45], %41 {strides = array<i32>} : memref<1x1x32xf32, #tpu.memory_space<vmem>>, vector<1x1x32xf32>,
    } else {
    }
    %cst = arith.constant 0.000000e+00 : f32
    %7 = vector.shape_cast %3 : vector<1x8x1xi1> to vector<1x8x1xi1>
    %8 = vector.broadcast %7 : vector<1x8x1xi1> to vector<1x8x32xi1>
    %9 = vector.broadcast %cst : f32 to vector<1x8x32xf32>
    %10 = arith.select %8, %0, %9 : vector<1x8x32xi1>, vector<1x8x32xf32>
    %c0_7 = arith.constant 0 : index
    %c0_8 = arith.constant 0 : index
    %c0_9 = arith.constant 0 : index
    %11 = vector.load %arg5[%c0_7, %c0_8, %c0_9] : memref<1x1x32xf32, #tpu.memory_space<vmem>>, vector<1x1x32xf32>
    %cst_10 = arith.constant dense<0.000000e+00> : vector<1x32xf32>
    %12 = vector.multi_reduction <add>, %10, %cst_10 [1] : vector<1x8x32xf32> to vector<1x32xf32>
    %13 = vector.shape_cast %12 : vector<1x32xf32> to vector<1x1x32xf32>
    %14 = arith.addf %11, %13 : vector<1x1x32xf32>
    %c0_11 = arith.constant 0 : index
    %c0_12 = arith.constant 0 : index
    %c0_13 = arith.constant 0 : index
    %15 = vector.load %arg5[%c0_11, %c0_12, %c0_13] : memref<1x1x32xf32, #tpu.memory_space<vmem>>, vector<1x1x32xf32>
    tpu.vector_store %arg5[%c0_11, %c0_12, %c0_13], %14 {strides = array<i32>} : memref<1x1x32xf32, #tpu.memory_space<vmem>>, vector<1x1x32xf32>,
    %c0_14 = arith.constant 0 : index
    %c0_15 = arith.constant 0 : index
    %c0_16 = arith.constant 0 : index
    %16 = vector.load %arg8[%c0_14, %c0_15, %c0_16] : memref<1x1x1xf32, #tpu.memory_space<vmem>>, vector<1x1x1xf32>
    %17 = arith.extui %3 : vector<1x8x1xi1> to vector<1x8x1xi32>
    %18 = arith.sitofp %17 : vector<1x8x1xi32> to vector<1x8x1xf32>
    %cst_17 = arith.constant dense<0.000000e+00> : vector<1x1xf32>
    %19 = vector.multi_reduction <add>, %18, %cst_17 [1] : vector<1x8x1xf32> to vector<1x1xf32>
    %20 = vector.shape_cast %19 : vector<1x1xf32> to vector<1x1x1xf32>
    %21 = arith.addf %16, %20 : vector<1x1x1xf32>
    %c0_18 = arith.constant 0 : index
    %c0_19 = arith.constant 0 : index
    %c0_20 = arith.constant 0 : index
    %22 = vector.load %arg8[%c0_18, %c0_19, %c0_20] : memref<1x1x1xf32, #tpu.memory_space<vmem>>, vector<1x1x1xf32>
    tpu.vector_store %arg8[%c0_18, %c0_19, %c0_20], %21 {strides = array<i32>} : memref<1x1x1xf32, #tpu.memory_space<vmem>>, vector<1x1x1xf32>,
    %cst_21 = arith.constant 0xFF800000 : f32
    %23 = vector.shape_cast %3 : vector<1x8x1xi1> to vector<1x8x1xi1>
    %24 = vector.broadcast %23 : vector<1x8x1xi1> to vector<1x8x32xi1>
    %25 = vector.broadcast %cst_21 : f32 to vector<1x8x32xf32>
    %26 = arith.select %24, %0, %25 : vector<1x8x32xi1>, vector<1x8x32xf32>
    %cst_22 = arith.constant dense<0xFF800000> : vector<1x32xf32>
    %27 = vector.multi_reduction <maximumf>, %26, %cst_22 [1] : vector<1x8x32xf32> to vector<1x32xf32>
    %28 = vector.shape_cast %27 : vector<1x32xf32> to vector<1x1x32xf32>
    %c0_23 = arith.constant 0 : index
    %c0_24 = arith.constant 0 : index
    %c0_25 = arith.constant 0 : index
    %29 = vector.load %arg6[%c0_23, %c0_24, %c0_25] : memref<1x1x32xf32, #tpu.memory_space<vmem>>, vector<1x1x32xf32>
    %30 = arith.maximumf %29, %28 : vector<1x1x32xf32>
    %c0_26 = arith.constant 0 : index
    %c0_27 = arith.constant 0 : index
    %c0_28 = arith.constant 0 : index
    %31 = vector.load %arg6[%c0_26, %c0_27, %c0_28] : memref<1x1x32xf32, #tpu.memory_space<vmem>>, vector<1x1x32xf32>
    tpu.vector_store %arg6[%c0_26, %c0_27, %c0_28], %30 {strides = array<i32>} : memref<1x1x32xf32, #tpu.memory_space<vmem>>, vector<1x1x32xf32>,
    %c0_i32_29 = arith.constant 0 : i32
    %32 = arith.cmpi eq, %arg1, %c0_i32_29 : i32
    %33 = arith.extui %32 : i1 to i32
    %c0_i32_30 = arith.constant 0 : i32
    %34 = arith.cmpi ne, %33, %c0_i32_30 : i32
    scf.if %34 {
      %c0_31 = arith.constant 0 : index
      %c0_32 = arith.constant 0 : index
      %c0_33 = arith.constant 0 : index
      %35 = vector.load %arg8[%c0_31, %c0_32, %c0_33] : memref<1x1x1xf32, #tpu.memory_space<vmem>>, vector<1x1x1xf32>
      %cst_34 = arith.constant 1.000000e+00 : f32
      %36 = vector.broadcast %cst_34 : f32 to vector<1x1x1xf32>
      %37 = arith.maximumf %35, %36 : vector<1x1x1xf32>
      %c0_35 = arith.constant 0 : index
      %c0_36 = arith.constant 0 : index
      %c0_37 = arith.constant 0 : index
      %38 = vector.load %arg5[%c0_35, %c0_36, %c0_37] : memref<1x1x32xf32, #tpu.memory_space<vmem>>, vector<1x1x32xf32>
      %39 = vector.broadcast %37 : vector<1x1x1xf32> to vector<1x1x32xf32>
      %40 = arith.divf %38, %39 : vector<1x1x32xf32>
      %c0_38 = arith.constant 0 : index
      %c0_39 = arith.constant 0 : index
      %c0_40 = arith.constant 0 : index
      %41 = vector.load %arg5[%c0_38, %c0_39, %c0_40] : memref<1x1x32xf32, #tpu.memory_space<vmem>>, vector<1x1x32xf32>
      tpu.vector_store %arg5[%c0_38, %c0_39, %c0_40], %40 {strides = array<i32>} : memref<1x1x32xf32, #tpu.memory_space<vmem>>, vector<1x1x32xf32>,
    } else {
    }
    return
  }
  func.func @transform_0(%arg0: i32, %arg1: i32) -> (i32, i32, i32) {
    %c0_i32 = arith.constant 0 : i32
    %c0_i32_0 = arith.constant 0 : i32
    return %arg0, %arg1, %c0_i32 : i32, i32, i32
  }
  func.func @transform_1(%arg0: i32, %arg1: i32) -> (i32, i32, i32) {
    %c0_i32 = arith.constant 0 : i32
    %c0_i32_0 = arith.constant 0 : i32
    return %arg0, %arg1, %c0_i32 : i32, i32, i32
  }
  func.func @transform_2(%arg0: i32, %arg1: i32) -> (i32, i32, i32) {
    %c0_i32 = arith.constant 0 : i32
    %c0_i32_0 = arith.constant 0 : i32
    return %arg0, %c0_i32, %arg1 : i32, i32, i32
  }
  func.func @transform_3(%arg0: i32, %arg1: i32) -> (i32, i32, i32) {
    %c0_i32 = arith.constant 0 : i32
    %c0_i32_0 = arith.constant 0 : i32
    %c0_i32_1 = arith.constant 0 : i32
    return %arg0, %c0_i32, %c0_i32_0 : i32, i32, i32
  }
  func.func @transform_4(%arg0: i32, %arg1: i32) -> (i32, i32, i32) {
    %c0_i32 = arith.constant 0 : i32
    %c0_i32_0 = arith.constant 0 : i32
    %c0_i32_1 = arith.constant 0 : i32
    return %arg0, %c0_i32, %c0_i32_0 : i32, i32, i32
  }
  func.func @transform_5(%arg0: i32, %arg1: i32) -> (i32, i32, i32) {
    %c0_i32 = arith.constant 0 : i32
    %c0_i32_0 = arith.constant 0 : i32
    %c0_i32_1 = arith.constant 0 : i32
    return %arg0, %c0_i32, %c0_i32_0 : i32, i32, i32
  }
}

</mosaic_0001>

<bundles_post_ra>
// kernel: tpu_custom_call.1
= control target key start
LH: loop header
LB: loop body
LE: loop exit
PB: predicated region body
PF: predicated region fallthrough
CT: control target
= control target key end

     0   :  { %11 = vsyncpa [#allocation4], 0  ;;  %s1035_s0 = inlined_call_operand.vmem [shape: f32[2,8,32], index: 0, kind: input, shape index: {}]   ;;  %s1036_s1 = inlined_call_operand.vmem [shape: s32[2,8,1], index: 1, kind: input, shape index: {}]   ;;  %s1037_s2 = inlined_call_operand.vmem [shape: f32[2,1,8], index: 2, kind: input, shape index: {}]   ;;  %s1038_s3 = inlined_call_operand.hbm [shape: f32[2,1,32], index: 3, kind: output, shape index: {0}]   ;;  %s1039_s4 = inlined_call_operand.hbm [shape: f32[2,1,32], index: 4, kind: output, shape index: {1}]   ;;  %s1040_s5 = inlined_call_operand.hbm [shape: f32[2,1,32], index: 5, kind: output, shape index: {2}]  }
   0x1   :  { %13 = vsyncpa [#allocation4 + $0x1], 0 }
   0x2   :  { %14 = vsyncpa [#allocation6], 0 }
   0x3   :  { %16 = vsyncpa [#allocation6 + $0x1], 0  ;;  %s831_s18 = smov 0   ;;  %s833_s19 = smov 0  }
   0x4   :  { %s835_s20 = smov 0   ;;  %s837_s2 = smov 0  }
   0x5   :  { %s839_s21 = smov 0   ;;  %s841_s22 = smov 0  }
   0x6 LB: > { %s577_s23 = sadd.s32 4294967295, %s793_s22   ;;  %s1041_s24 = sadd.s32 4294967294, %s793_s22   ;;  %s793_s22 = sphi %s841_s22, %s22_s22   ;;  %s789_s21 = sphi %s839_s21, %s1050_s21   ;;  %s785_s2 = sphi %s837_s2, %s1049_s2   ;;  %s781_s20 = sphi %s835_s20, %s1048_s20   ;;  %s777_s19 = sphi %s833_s19, %s1047_s19   ;;  %s773_s18 = sphi %s831_s18, %s1046_s18  }
   0x7   : > { %s34_s25 = sadd.s32 1, %s789_s21  ;;  %s125_s26 = sadd.s32 1, %s781_s20 }
   0x8   : > { %p36_p0 = scmp.ge.s32.totalorder %s34_s25, 2  ;;  %p135_p1 = scmp.ne.s32.totalorder %s781_s20, %s777_s19 }
   0x9   : > { %p136_p2 = scmp.eq.s32.totalorder %s577_s23, 1  ;;  %p141_p3 = scmp.ne.s32.totalorder %s777_s19, %s773_s18 }
   0xa   : > { %s1052_s25 = smov (%p36_p0, %s34_s25), 0  ;;  %p142_p5 = scmp.eq.s32.totalorder %s1041_s24, 1 }
   0xb   : > { %p873_p4 = por %p136_p2, %p135_p1  ;;  %s122_s28 = ssub.s32 %s789_s21, %s1052_s25 }
   0xc   : > { %p581_p6 = scmp.ge.s32.totalorder %s793_s22, 1  ;;  %p123_p7 = scmp.eq.s32.totalorder %s122_s28, 0 }
   0xd   : > { %p882_p8 = por %p142_p5, %p141_p3  ;;  %p241_p9 = scmp.lt.s32.totalorder %s793_s22, 3 }
   0xe   : > { %s888_s30 = scalar_select %p123_p7, %s781_s20, %s125_s26  }
   0xf   : > { %p242_p10 = pnand %p581_p6, %p241_p9 }
  0x10   : > { %p291_p11 = scmp.lt.s32.totalorder (!%p242_p10), %s785_s2, 1  ;;  %s892_s6 = sand.u32 (!%p242_p10), 1, %s777_s19  }
  0x11   : > { %245 = sbr.rel (%p242_p10) target bundleno = 237 (0xed), region = 32  ;;  %s897_s8 = scalar_lea.vmem (!%p242_p10), [#allocation3], %s892_s6 }
  0x12   : > { %s905_s13 = scalar_lea.vmem (!%p242_p10), [#allocation5], %s892_s6  ;;  %s290_s17 = scalar_lea.vmem (!%p242_p10), [#allocation7], %s892_s6 }
  0x13   : > { %s917_s26 = sand.u32 (!%p242_p10), 1, %s577_s23   ;;  %s922_s28 = sshll.u32 (!%p242_p10), %s785_s2, 4 }
  0x14   : > { %s929_s23 = scalar_lea.hbm (!%p242_p10), %s1039_s4, %s922_s28  ;;  %s937_s14 = scalar_lea.hbm (!%p242_p10), %s1040_s5, %s922_s28 }
  0x16   : > { %vm318_vm0 = vcmask 253952   ;;  %vm321_vm1 = vcmask 0   ;;  %v795_v0 = vmov 0   ;;  %v796_v1 = vmov 0.0   ;;  %s292_s7 = scalar_select %p291_p11, %s785_s2, 1 }
  0x17   : > { %658 = vset.pattern.permute.xlu0 %v795_v0  ;;  %322 = vst.msk [vmem:[#allocation2] sm:$0x1] %vm321_vm1, %v796_v1  ;;  %vm344_vm2 = vcmask 7168   ;;  %v797_v14 = vmov -inf   ;;  %vm331_vm4 = vcmask 261120   ;;  %v377_v37 = vlaneseq }
  0x18   : > { %319 = vst.msk [vmem:[%s897_s8] sm:$0x1] %vm318_vm0, %v796_v1  ;;  %s582_s9 = sshll.u32 %s292_s7, 3  ;;  %320 = vst.msk [vmem:[%s905_s13] sm:$0x1] %vm318_vm0, %v797_v14  ;;  %s418_s7 = sshll.u32 %s905_s13, 4  ;;  %s931_s7 = int_to_ptr.vmem [resolvable:$true] %s418_s7 }
  0x19   : > { %s304_s12 = scalar_lea.vmem %s1036_s1, %s582_s9  ;;  %s297_s16 = scalar_lea.vmem %s1035_s0, %s582_s9  ;;  %v378_v40 = vshrl.u32 %v377_v37, 7 }
  0x1a   : > { %v312_v2 = vld [vmem:[%s304_s12] sm:$0xff]  ;;  %s431_s9 = sshll.u32 %s290_s17, 4  ;;  %s939_s9 = int_to_ptr.vmem [resolvable:$true] %s431_s9 }
  0x1b   : > { %vm313_vm3 = vcmp.ne.s32.totalorder %v312_v2, 0  ;;  %v311_v17 = vld [vmem:[%s297_s16] sm:$0xff]  ;;  %s661_s16 = scalar_lea.vmem %s931_s7, 16 }
  0x1c   : > { %v324_v3 = vsel %vm313_vm3, 1, %v795_v0  ;;  %v584_v4 = vsel %vm313_vm3, 1.0, %v796_v1  ;;  %323 = vst.msk [vmem:[%s290_s17] sm:$0x1] %vm318_vm0, %v311_v17  ;;  %p662_p12 = scmp.ne.s32.totalorder %s931_s7, %s661_s16  ;;  %s798_s17 = smov [#allocation5]  }
  0x1d   : > { %v345_v5 = vsel %vm344_vm2, %v584_v4, 0.0  ;;  %326 = vperm.xlu0 %658, %v324_v3   ;;  %s665_s10 = sshll.u32 %s798_s17, 4  ;;  %s666_s10 = int_to_ptr.vmem [resolvable:$false] %s665_s10 }
  0x1e   : > { %v346_v6 = vrot.slane %v345_v5, 4  ;;  %v342_v11 = vld [vmem:[#allocation2] sm:$0x1]  ;;  %p663_p13 = pnand %p662_p12, %p873_p4  ;;  %s667_s11 = scalar_lea.vmem %s666_s10, 32 }
  0x1f   : > { %v330_v33 = vld [vmem:[%s897_s8] sm:$0x1]  ;;  %p668_p1 = scmp.lt.s32.totalorder %s931_s7, %s666_s10  ;;  %p669_p2 = scmp.lt.s32.totalorder %s667_s11, %s661_s16 }
  0x20   : > { %v347_v7 = vadd.f32 %v346_v6, %v345_v5  ;;  %v363_v34 = vld [vmem:[%s905_s13] sm:$0x1]  ;;  %p664_p0 = pneg %p663_p13 }
  0x21   : > { %p670_p3 = por %p669_p2, %p668_p1 }
  0x22   : > { %v348_v8 = vrot.slane %v347_v7, 2 }
  0x23   : > { %p671_p5 = pnand %p670_p3, %p664_p0 }
  0x24   : > { %v349_v9 = vadd.f32 %v348_v8, %v347_v7 }
  0x26   : > { %v350_v10 = vrot.slane %v349_v9, 1 }
  0x28   : > { %v351_v12 = vadd.f32 %v350_v10, %v349_v9 }
  0x2a   : > { %v352_v13 = vadd.f32 %v351_v12, %v342_v11 }
  0x2c   : > { %354 = vst.msk [vmem:[#allocation2] sm:$0x1] %vm321_vm1, %v352_v13 }
  0x33   : > { %v369_v15 = vld [vmem:[#allocation2] sm:$0x1] }
  0x34   : > { %v370_v16 = vmax.f32 %v369_v15, 1.0 }
  0x36   : > { %374 = vperm.xlu0 %658, %v370_v16  }
  0x98   : > { %v327_v18 = vpop.permute.xlu0 %326 }
  0x99   : > { %vm328_vm5 = vcmp.eq.s32.totalorder %v327_v18, 1 }
  0x9a   : > { %v329_v19 = vsel %vm328_vm5, %v311_v17, 0.0  ;;  %v355_v20 = vsel %vm328_vm5, %v311_v17, -inf }
  0x9b   : > { %v332_v21 = vsel %vm331_vm4, %v329_v19, 0.0  ;;  %v356_v22 = vsel %vm331_vm4, %v355_v20, -inf }
  0x9c   : > { %v333_v23 = vrot.slane %v332_v21, 4  ;;  %v357_v24 = vrot.slane %v356_v22, 4 }
  0x9e   : > { %v334_v25 = vadd.f32 %v333_v23, %v332_v21  ;;  %v358_v26 = vmax.f32 %v356_v22, %v357_v24 }
  0xa0   : > { %v335_v27 = vrot.slane %v334_v25, 2  ;;  %v359_v28 = vrot.slane %v358_v26, 2 }
  0xa2   : > { %v336_v29 = vadd.f32 %v335_v27, %v334_v25  ;;  %v360_v30 = vmax.f32 %v358_v26, %v359_v28 }
  0xa4   : > { %v337_v31 = vrot.slane %v336_v29, 1  ;;  %v361_v32 = vrot.slane %v360_v30, 1 }
  0xa6   : > { %v338_v35 = vadd.f32 %v337_v31, %v336_v29  ;;  %v362_v36 = vmax.f32 %v360_v30, %v361_v32 }
  0xa8   : > { %v339_v38 = vadd.f32 %v338_v35, %v330_v33  ;;  %v364_v39 = vmax.f32 %v363_v34, %v362_v36 }
  0xaa   : > { %341 = vst.msk [vmem:[%s897_s8] sm:$0x1] %vm318_vm0, %v339_v38  ;;  %365 = vst.msk [vmem:[%s905_s13] sm:$0x1] %vm318_vm0, %v364_v39 }
  0xab   : > { %674 = shalt.err (!%p671_p5)
}
  0xac   : > { %s675_s13 = scalar_lea.hbm %s929_s23, 16  ;;  %s679_s17 = scalar_lea.hbm %s1039_s4, 32 }
  0xad   : > { %p676_p6 = scmp.ne.s32.totalorder %s929_s23, %s675_s13  ;;  %p680_p10 = scmp.lt.s32.totalorder %s929_s23, %s1039_s4 }
  0xae   : > { %p681_p11 = scmp.lt.s32.totalorder %s679_s17, %s675_s13 }
  0xaf   : > { %p677_p7 = pnand %p676_p6, %p873_p4 }
  0xb0   : > { %p682_p12 = por %p681_p11, %p680_p10 }
  0xb1   : > { %p678_p9 = pneg %p677_p7 }
  0xb3   : > { %p683_p13 = pnand %p682_p12, %p678_p9 }
  0xb5   : > { %686 = shalt.err (!%p683_p13)
}
  0xb6   : > { %s1044_s16 = scalar_lea.sflag [#allocation6], %s917_s26  ;;  %s687_s10 = scalar_lea.vmem %s939_s9, 16 }
  0xb7   : > { %591 = dma.vmem_to_hbm [thread:$0]  (%p873_p4), %s931_s7, 16, %s929_s23, %s1044_s16  }
  0xb8   : > { %p688_p0 = scmp.ne.s32.totalorder %s939_s9, %s687_s10  ;;  %s799_s24 = smov [#allocation7]  }
  0xb9   : > { %s691_s15 = sshll.u32 %s799_s24, 4  ;;  %s692_s15 = int_to_ptr.vmem [resolvable:$false] %s691_s15 }
  0xba   : > { %p689_p1 = pnand %p688_p0, %p873_p4  ;;  %s693_s11 = scalar_lea.vmem %s692_s15, 32 }
  0xbb   : > { %p694_p3 = scmp.lt.s32.totalorder %s939_s9, %s692_s15  ;;  %p695_p5 = scmp.lt.s32.totalorder %s693_s11, %s687_s10 }
  0xbc   : > { %p690_p2 = pneg %p689_p1 }
  0xbd   : > { %p696_p6 = por %p695_p5, %p694_p3 }
  0xbf   : > { %p697_p7 = pnand %p696_p6, %p690_p2 }
  0xc1   : > { %700 = shalt.err (!%p697_p7)
}
  0xc2   : > { %s701_s13 = scalar_lea.hbm %s937_s14, 16  ;;  %s705_s12 = scalar_lea.hbm %s1040_s5, 32 }
  0xc3   : > { %p702_p9 = scmp.ne.s32.totalorder %s937_s14, %s701_s13  ;;  %p706_p12 = scmp.lt.s32.totalorder %s937_s14, %s1040_s5 }
  0xc4   : > { %p707_p13 = scmp.lt.s32.totalorder %s705_s12, %s701_s13 }
  0xc5   : > { %p703_p10 = pnand %p702_p9, %p873_p4 }
  0xc6   : > { %p708_p0 = por %p707_p13, %p706_p12 }
  0xc7   : > { %p704_p11 = pneg %p703_p10 }
  0xc9   : > { %p709_p1 = pnand %p708_p0, %p704_p11 }
  0xcb   : > { %712 = shalt.err (!%p709_p1)
}
  0xcc   : > { %592 = dma.vmem_to_hbm [thread:$0]  (%p873_p4), %s939_s9, 16, %s937_s14, %s1044_s16   ;;  %v379_v41 = vsub.s32 0, %v378_v40  ;;  %v375_v42 = vpop.permute.xlu0 %374  ;;  %v371_v45 = vld [vmem:[%s897_s8] sm:$0x1] }
  0xcd   : > { %s405_s10 = sshll.u32 %s897_s8, 4  ;;  %s403_s26 = scalar_lea.hbm %s1038_s3, %s922_s28  ;;  %s406_s10 = int_to_ptr.vmem [resolvable:$true] %s405_s10 }
  0xce   : > { %v380_v43 = vrot.slane %v375_v42, %v379_v41  ;;  %s385_s11 = scalar_lea.sflag [#allocation4], %s892_s6  ;;  %s713_s13 = scalar_lea.vmem %s406_s10, 16 }
  0xcf   : > { %p714_p2 = scmp.ne.s32.totalorder %s406_s10, %s713_s13  ;;  %s800_s9 = smov [#allocation3]  }
  0xd0   : > { %659 = vrcp.f32 %v380_v43  ;;  %s717_s14 = sshll.u32 %s800_s9, 4  ;;  %s718_s14 = int_to_ptr.vmem [resolvable:$false] %s717_s14 }
  0xd1   : > { %p715_p3 = pnand %p714_p2, %p873_p4  ;;  %s719_s7 = scalar_lea.vmem %s718_s14, 32 }
  0xd2   : > { %p720_p6 = scmp.lt.s32.totalorder %s406_s10, %s718_s14  ;;  %p721_p7 = scmp.lt.s32.totalorder %s719_s7, %s713_s13 }
  0xd3   : > { %p716_p5 = pneg %p715_p3 }
  0xd4   : > { %p722_p9 = por %p721_p7, %p720_p6 }
  0xd6   : > { %p723_p10 = pnand %p722_p9, %p716_p5 }
  0xdd   : > { %v660_v44 = vpop.eup %659 }
  0xde   : > { %v382_v46 = vmul.f32 %v660_v44, %v371_v45 }
  0xe0   : > { %383 = vst.msk [vmem:[%s897_s8] sm:$0x1] %vm318_vm0, %v382_v46 }
  0xe1   : > { %726 = shalt.err (!%p723_p10)
}
  0xe2   : > { %s727_s23 = scalar_lea.hbm %s403_s26, 16  ;;  %s731_s28 = scalar_lea.hbm %s1038_s3, 32 }
  0xe3   : > { %p728_p11 = scmp.ne.s32.totalorder %s403_s26, %s727_s23  ;;  %p732_p0 = scmp.lt.s32.totalorder %s403_s26, %s1038_s3 }
  0xe4   : > { %p733_p1 = scmp.lt.s32.totalorder %s731_s28, %s727_s23 }
  0xe5   : > { %p729_p12 = pnand %p728_p11, %p873_p4 }
  0xe6   : > { %p734_p2 = por %p733_p1, %p732_p0 }
  0xe7   : > { %p730_p13 = pneg %p729_p12 }
  0xe9   : > { %p735_p3 = pnand %p734_p2, %p730_p13 }
  0xeb   : > { %738 = shalt.err (!%p735_p3)
}
  0xec   : > { %590 = dma.vmem_to_hbm [thread:$0]  (%p873_p4), %s406_s10, 16, %s403_s26, %s385_s11  }
  0xed PF: > { %p606_p5 = scmp.ge.s32.totalorder %s793_s22, 2  ;;  %s443_s17 = sand.u32 1, %s773_s18  }
  0xee   : > { %s444_s16 = scalar_lea.sflag [#allocation4], %s443_s17 }
  0xef   : > { %p597_p6 = pnand %p606_p5, %p882_p8 }
  0xf1   : > { %p598_p7 = pneg %p597_p6 }
  0xf3   : > { %764 = dma.done.wait (%p598_p7), %s444_s16, 16  }
  0xf4   : > { %766 = vsyncadd (%p598_p7), %s444_s16, 4294967280  ;;  %s1045_s24 = sadd.s32 4294967294, %s793_s22  }
  0xf5   : > { %s451_s15 = sand.u32 1, %s1045_s24  }
  0xf6   : > { %s452_s13 = scalar_lea.sflag [#allocation6], %s451_s15 }
  0xf7   : > { %768 = dma.done.wait (%p598_p7), %s452_s13, 32  }
  0xf8   : > { %770 = vsyncadd (%p598_p7), %s452_s13, 4294967264  ;;  %s22_s22 = sadd.s32 1, %s793_s22   ;;  %s1046_s18 = smov %s777_s19 }
  0xf9   : > { %p19_p4 = scmp.ge.s32.totalorder %s22_s22, 4   ;;  %s1047_s19 = smov %s781_s20 }
  0xfa   : > { %s1048_s20 = smov %s888_s30  ;;  %s1049_s2 = smov %s789_s21 }
  0xfb   : > { %s1050_s21 = smov %s1052_s25  ;;  %21 = sbr.rel (!%p19_p4) target bundleno = 6 (0x6), region = 113 }
 0x100   :  { %464 = vsyncpa [#allocation4], 1 }
 0x101   :  { %466 = vsyncpa [#allocation4 + $0x1], 1 }
 0x102   :  { %467 = vsyncpa [#allocation6], 1 }
 0x103   :  { %469 = vsyncpa [#allocation6 + $0x1], 1 }

</bundles_post_ra>
